<compile_context>
chip_gen: v7x
topology: tpu7x:2x2x1
jax: 0.10.0
libtpu: 0.0.40
codegen_flags: <defaults>
</compile_context>

<pallas_src>
import functools

import jax
import jax.numpy as jnp
import numpy as np
from jax.experimental import pallas as pl
from jax.experimental.pallas import tpu as pltpu

SUBJECT_CATEGORY_ID = 0


def _round_up(x, m):
    return ((x + m - 1) // m) * m


def _postprocess_kernel(in_ref, out_ref, *, num_obj_cls, num_verb_cls, pad_lanes):
    co = num_obj_cls          # includes the trailing no-object class
    v = num_verb_cls

    x = in_ref[...]                                     # (Bt, Q, Co+V+12) f32
    bt, q, _ = x.shape

    # Static lane slices of the fused input slab (layout plumbing only).
    logits = x[..., 0:co]                               # obj logits
    verb_logits = x[..., co:co + v]
    sub_bx = x[..., co + v:co + v + 4]                  # cxcywh
    obj_bx = x[..., co + v + 4:co + v + 8]              # cxcywh
    scale = x[..., co + v + 8:co + v + 12]              # (w, h, w, h) per image

    # ---- object scores / labels without materializing the full softmax ----
    fg = logits[..., 0:co - 1]                          # foreground classes
    max_fg = jnp.max(fg, axis=-1, keepdims=True)        # (Bt, Q, 1)
    max_all = jnp.maximum(max_fg, logits[..., co - 1:co])   # max over all classes
    denom = jnp.sum(jnp.exp(logits - max_all), axis=-1, keepdims=True)
    obj_scores = jnp.exp(max_fg - max_all) / denom      # exact divide (tolerance)

    # first-occurrence argmax over foreground classes (monotone => same as
    # argmax of the softmax)
    lane = jax.lax.broadcasted_iota(jnp.int32, fg.shape, 2)
    obj_labels = jnp.min(jnp.where(fg == max_fg, lane, co), axis=-1, keepdims=True)

    # ---- verb scores: sigmoid(verb_logits) * obj_scores ----
    verb_scores = jax.nn.sigmoid(verb_logits) * obj_scores

    # ---- boxes: cxcywh -> xyxy, scaled by per-image (w, h, w, h) ----
    def cxcywh_to_xyxy(bx):
        cxcy = bx[..., 0:2]
        half = 0.5 * bx[..., 2:4]
        # [cx - 0.5w, cy - 0.5h, cx + 0.5w, cy + 0.5h] — bit-identical grouping
        return jnp.concatenate([cxcy - half, cxcy + half], axis=-1)

    sub_xyxy = cxcywh_to_xyxy(sub_bx) * scale
    obj_xyxy = cxcywh_to_xyxy(obj_bx) * scale

    # ---- single lane-dense output slab, one unmasked full-block store ----
    # lane 0: obj label (small exact integer stored as f32)
    # lanes 1:5 / 5:9: sub / obj xyxy   lanes 9:9+V: verb scores   rest: zeros
    pieces = [obj_labels.astype(jnp.float32), sub_xyxy, obj_xyxy, verb_scores]
    if pad_lanes:
        pieces.append(jnp.zeros((bt, q, pad_lanes), jnp.float32))
    out_ref[...] = jnp.concatenate(pieces, axis=-1)


@functools.partial(jax.jit, static_argnames=("subject_category_id", "block_b"))
def _postprocess_batched(obj_logits, verb_logits, sub_boxes, obj_boxes,
                         target_sizes, *, subject_category_id=SUBJECT_CATEGORY_ID,
                         block_b=None):
    """Returns batched (labels[B,2Q] i32, boxes[B,2Q,4] f32, verb_scores[B,Q,V] f32)."""
    B, Q, Co = obj_logits.shape
    V = verb_logits.shape[-1]
    f32 = jnp.float32

    if block_b is None:
        # Single grid step: per-step compute is far below the ~0.35us fixed
        # step overhead at these sizes (only split for very large batches at
        # production Q/Co/V, and only to feed both v7x TensorCores).
        block_b = B
    assert B % block_b == 0

    # --- fused lane-dense input slab: logits ++ verbs ++ boxes ++ scale ---
    img_h = target_sizes[:, 0].astype(f32)
    img_w = target_sizes[:, 1].astype(f32)
    scale = jnp.stack([img_w, img_h, img_w, img_h], axis=-1)        # (B, 4)
    scale_bq = jnp.broadcast_to(scale[:, None, :], (B, Q, 4))       # (B, Q, 4)
    packed_in = jnp.concatenate(
        [obj_logits.astype(f32), verb_logits.astype(f32),
         sub_boxes.astype(f32), obj_boxes.astype(f32), scale_bq], axis=-1)
    l_in = packed_in.shape[-1]                                       # Co + V + 12

    # --- lane-dense output slab padded to a multiple of 128 lanes ---
    # TODO(synk): for production DETR-HOI sizes also pad Q to a multiple of 8
    # in this wrapper (Q=8 here already is).
    l_used = 1 + 4 + 4 + V
    l_out = _round_up(l_used, 128)

    kernel = functools.partial(_postprocess_kernel, num_obj_cls=Co,
                               num_verb_cls=V, pad_lanes=l_out - l_used)

    packed_out = pl.pallas_call(
        kernel,
        out_shape=jax.ShapeDtypeStruct((B, Q, l_out), f32),
        grid=(B // block_b,),
        in_specs=[pl.BlockSpec((block_b, Q, l_in), lambda b: (b, 0, 0))],
        out_specs=pl.BlockSpec((block_b, Q, l_out), lambda b: (b, 0, 0)),
        compiler_params=pltpu.CompilerParams(
            dimension_semantics=("parallel",)),
    )(packed_in)

    # --- unpack (all fused under this jit; labels are exact small ints) ---
    obj_labels = packed_out[..., 0].astype(jnp.int32)                # (B, Q)
    sub_xyxy = packed_out[..., 1:5]
    obj_xyxy = packed_out[..., 5:9]
    verb_scores = packed_out[..., 9:9 + V]

    labels = jnp.concatenate(
        [jnp.full((B, Q), subject_category_id, jnp.int32), obj_labels], axis=1)
    boxes = jnp.concatenate([sub_xyxy, obj_xyxy], axis=1)            # (B, 2Q, 4)
    return labels, boxes, verb_scores


def postprocess_hoi(obj_logits, verb_logits, sub_boxes, obj_boxes, target_sizes,
                    *, subject_category_id=SUBJECT_CATEGORY_ID, block_b=None):
    B, Q = obj_logits.shape[:2]
    labels, boxes, verb_scores = _postprocess_batched(
        obj_logits, verb_logits, sub_boxes, obj_boxes, target_sizes,
        subject_category_id=subject_category_id, block_b=block_b)

    # Single device fetch, then pure-numpy per-image slicing (no device ops).
    labels_h, boxes_h, verbs_h = jax.device_get((labels, boxes, verb_scores))
    ids = np.arange(2 * Q)
    # TODO(synk): per-image dict packaging / .to('cpu') is host-side glue.
    results = []
    for i in range(B):
        results.append({
            "labels": labels_h[i],
            "boxes": boxes_h[i],
            "verb_scores": verbs_h[i],
            "sub_ids": ids[:Q],
            "obj_ids": ids[Q:],
        })
    return results


def _reference(obj_logits, verb_logits, sub_boxes, obj_boxes, target_sizes):
    obj_prob = jax.nn.softmax(obj_logits, -1)
    obj_scores = obj_prob[..., :-1].max(-1)
    obj_labels = obj_prob[..., :-1].argmax(-1).astype(jnp.int32)
    verb_scores = jax.nn.sigmoid(verb_logits) * obj_scores[..., None]
    img_h, img_w = target_sizes[:, 0], target_sizes[:, 1]
    scale = jnp.stack([img_w, img_h, img_w, img_h], axis=1)[:, None, :]

    def conv(bx):
        cx, cy, w, h = bx[..., 0], bx[..., 1], bx[..., 2], bx[..., 3]
        return jnp.stack([cx - 0.5 * w, cy - 0.5 * h,
                          cx + 0.5 * w, cy + 0.5 * h], -1)

    sb = conv(sub_boxes) * scale
    ob = conv(obj_boxes) * scale
    B, Q = obj_labels.shape
    labels = jnp.concatenate(
        [jnp.full((B, Q), SUBJECT_CATEGORY_ID, jnp.int32), obj_labels], axis=1)
    boxes = jnp.concatenate([sb, ob], axis=1)
    return labels, boxes, verb_scores


if __name__ == "__main__":
    key = jax.random.PRNGKey(0)
    B, Q, NUM_OBJ_CLASSES, V = 2, 8, 11, 16           # obj logits have +1 no-object
    k1, k2, k3, k4 = jax.random.split(key, 4)

    obj_logits = jax.random.normal(k1, (B, Q, NUM_OBJ_CLASSES + 1), jnp.float32)
    verb_logits = jax.random.normal(k2, (B, Q, V), jnp.float32)
    sub_boxes = jax.random.uniform(k3, (B, Q, 4), jnp.float32, 0.1, 0.9)
    obj_boxes = jax.random.uniform(k4, (B, Q, 4), jnp.float32, 0.1, 0.9)
    target_sizes = jnp.array([[480.0, 640.0], [320.0, 512.0]], jnp.float32)

    # Run the kernel once and block on the (device-side) batched result.
    batched = _postprocess_batched(
        obj_logits, verb_logits, sub_boxes, obj_boxes, target_sizes,
        subject_category_id=SUBJECT_CATEGORY_ID, block_b=None)
    jax.block_until_ready(batched)

    results = postprocess_hoi(obj_logits, verb_logits, sub_boxes, obj_boxes,
                              target_sizes)

    ref_labels, ref_boxes, ref_verbs = _reference(
        obj_logits, verb_logits, sub_boxes, obj_boxes, target_sizes)
    ref_labels, ref_boxes, ref_verbs = jax.device_get(
        (ref_labels, ref_boxes, ref_verbs))
    for i in range(B):
        np.testing.assert_array_equal(results[i]["labels"], ref_labels[i])
        np.testing.assert_allclose(results[i]["boxes"], ref_boxes[i],
                                   rtol=1e-5, atol=1e-5)
        np.testing.assert_allclose(results[i]["verb_scores"], ref_verbs[i],
                                   rtol=1e-5, atol=1e-5)

    print("KERNEL_OK")
</pallas_src>

<mosaic_0001>
module attributes {stable_mosaic.version = 11 : i64} {
  func.func @_postprocess_kernel(%arg0: i32, %arg1: memref<2x8x40xf32, #tpu.memory_space<vmem>>, %arg2: memref<2x8x128xf32, #tpu.memory_space<vmem>>) attributes {dimension_semantics = [#tpu.dimension_semantics<parallel>], iteration_bounds = array<i64: 1>, scalar_prefetch = 0 : i64, scratch_operands = 0 : i64, tpu.core_type = #tpu.core_type<tc>, window_params = [{transform_indices = @transform_0, window_bounds = array<i64: 2, 8, 40>}, {transform_indices = @transform_1, window_bounds = array<i64: 2, 8, 128>}]} {
    %c0 = arith.constant 0 : index
    %c0_0 = arith.constant 0 : index
    %c0_1 = arith.constant 0 : index
    %0 = vector.load %arg1[%c0, %c0_0, %c0_1] : memref<2x8x40xf32, #tpu.memory_space<vmem>>, vector<2x8x40xf32>
    %1 = vector.extract_strided_slice %0 {offsets = [0, 0, 0], sizes = [2, 8, 12], strides = [1, 1, 1]} : vector<2x8x40xf32> to vector<2x8x12xf32>
    %2 = vector.extract_strided_slice %0 {offsets = [0, 0, 12], sizes = [2, 8, 16], strides = [1, 1, 1]} : vector<2x8x40xf32> to vector<2x8x16xf32>
    %3 = vector.extract_strided_slice %0 {offsets = [0, 0, 28], sizes = [2, 8, 4], strides = [1, 1, 1]} : vector<2x8x40xf32> to vector<2x8x4xf32>
    %4 = vector.extract_strided_slice %0 {offsets = [0, 0, 32], sizes = [2, 8, 4], strides = [1, 1, 1]} : vector<2x8x40xf32> to vector<2x8x4xf32>
    %5 = vector.extract_strided_slice %0 {offsets = [0, 0, 36], sizes = [2, 8, 4], strides = [1, 1, 1]} : vector<2x8x40xf32> to vector<2x8x4xf32>
    %6 = vector.extract_strided_slice %1 {offsets = [0, 0, 0], sizes = [2, 8, 11], strides = [1, 1, 1]} : vector<2x8x12xf32> to vector<2x8x11xf32>
    %cst = arith.constant dense<0xFF800000> : vector<2x8xf32>
    %7 = vector.multi_reduction <maximumf>, %6, %cst [2] : vector<2x8x11xf32> to vector<2x8xf32>
    %8 = vector.shape_cast %7 : vector<2x8xf32> to vector<2x8x1xf32>
    %9 = vector.extract_strided_slice %1 {offsets = [0, 0, 11], sizes = [2, 8, 1], strides = [1, 1, 1]} : vector<2x8x12xf32> to vector<2x8x1xf32>
    %10 = arith.maximumf %8, %9 : vector<2x8x1xf32>
    %11 = vector.broadcast %10 : vector<2x8x1xf32> to vector<2x8x12xf32>
    %12 = arith.subf %1, %11 : vector<2x8x12xf32>
    %13 = math.exp %12 : vector<2x8x12xf32>
    %cst_2 = arith.constant dense<0.000000e+00> : vector<2x8xf32>
    %14 = vector.multi_reduction <add>, %13, %cst_2 [2] : vector<2x8x12xf32> to vector<2x8xf32>
    %15 = vector.shape_cast %14 : vector<2x8xf32> to vector<2x8x1xf32>
    %16 = arith.subf %8, %10 : vector<2x8x1xf32>
    %17 = math.exp %16 : vector<2x8x1xf32>
    %18 = arith.divf %17, %15 : vector<2x8x1xf32>
    %19 = tpu.iota {dimensions = array<i32: 2>} : vector<2x8x11xi32>
    %20 = vector.broadcast %8 : vector<2x8x1xf32> to vector<2x8x11xf32>
    %21 = arith.cmpf oeq, %6, %20 : vector<2x8x11xf32>
    %c12_i32 = arith.constant 12 : i32
    %22 = vector.broadcast %c12_i32 : i32 to vector<2x8x11xi32>
    %23 = arith.select %21, %19, %22 : vector<2x8x11xi1>, vector<2x8x11xi32>
    %cst_3 = arith.constant dense<2147483647> : vector<2x8xi32>
    %24 = vector.multi_reduction <minsi>, %23, %cst_3 [2] : vector<2x8x11xi32> to vector<2x8xi32>
    %25 = vector.shape_cast %24 : vector<2x8xi32> to vector<2x8x1xi32>
    %26 = arith.negf %2 : vector<2x8x16xf32>
    %27 = math.exp %26 : vector<2x8x16xf32>
    %cst_4 = arith.constant 1.000000e+00 : f32
    %28 = vector.broadcast %cst_4 : f32 to vector<2x8x16xf32>
    %29 = arith.addf %28, %27 : vector<2x8x16xf32>
    %30 = arith.divf %28, %29 : vector<2x8x16xf32>
    %31 = vector.broadcast %18 : vector<2x8x1xf32> to vector<2x8x16xf32>
    %32 = arith.mulf %30, %31 : vector<2x8x16xf32>
    %33 = vector.extract_strided_slice %3 {offsets = [0, 0, 0], sizes = [2, 8, 2], strides = [1, 1, 1]} : vector<2x8x4xf32> to vector<2x8x2xf32>
    %34 = vector.extract_strided_slice %3 {offsets = [0, 0, 2], sizes = [2, 8, 2], strides = [1, 1, 1]} : vector<2x8x4xf32> to vector<2x8x2xf32>
    %cst_5 = arith.constant 5.000000e-01 : f32
    %35 = vector.broadcast %cst_5 : f32 to vector<2x8x2xf32>
    %36 = arith.mulf %35, %34 : vector<2x8x2xf32>
    %37 = arith.subf %33, %36 : vector<2x8x2xf32>
    %38 = arith.addf %33, %36 : vector<2x8x2xf32>
    %39 = tpu.concatenate %37, %38 in 2 : vector<2x8x2xf32>, vector<2x8x2xf32> -> vector<2x8x4xf32>
    %40 = arith.mulf %39, %5 : vector<2x8x4xf32>
    %41 = vector.extract_strided_slice %4 {offsets = [0, 0, 0], sizes = [2, 8, 2], strides = [1, 1, 1]} : vector<2x8x4xf32> to vector<2x8x2xf32>
    %42 = vector.extract_strided_slice %4 {offsets = [0, 0, 2], sizes = [2, 8, 2], strides = [1, 1, 1]} : vector<2x8x4xf32> to vector<2x8x2xf32>
    %cst_6 = arith.constant 5.000000e-01 : f32
    %43 = vector.broadcast %cst_6 : f32 to vector<2x8x2xf32>
    %44 = arith.mulf %43, %42 : vector<2x8x2xf32>
    %45 = arith.subf %41, %44 : vector<2x8x2xf32>
    %46 = arith.addf %41, %44 : vector<2x8x2xf32>
    %47 = tpu.concatenate %45, %46 in 2 : vector<2x8x2xf32>, vector<2x8x2xf32> -> vector<2x8x4xf32>
    %48 = arith.mulf %47, %5 : vector<2x8x4xf32>
    %49 = arith.sitofp %25 : vector<2x8x1xi32> to vector<2x8x1xf32>
    %cst_7 = arith.constant 0.000000e+00 : f32
    %50 = vector.broadcast %cst_7 : f32 to vector<2x8x103xf32>
    %51 = tpu.concatenate %49, %40, %48, %32, %50 in 2 : vector<2x8x1xf32>, vector<2x8x4xf32>, vector<2x8x4xf32>, vector<2x8x16xf32>, vector<2x8x103xf32> -> vector<2x8x128xf32>
    %c0_8 = arith.constant 0 : index
    %c0_9 = arith.constant 0 : index
    %c0_10 = arith.constant 0 : index
    %52 = vector.load %arg2[%c0_8, %c0_9, %c0_10] : memref<2x8x128xf32, #tpu.memory_space<vmem>>, vector<2x8x128xf32>
    tpu.vector_store %arg2[%c0_8, %c0_9, %c0_10], %51 {strides = array<i32>} : memref<2x8x128xf32, #tpu.memory_space<vmem>>, vector<2x8x128xf32>,
    return
  }
  func.func @transform_0(%arg0: i32) -> (i32, i32, i32) {
    %c0_i32 = arith.constant 0 : i32
    %c0_i32_0 = arith.constant 0 : i32
    %c0_i32_1 = arith.constant 0 : i32
    return %arg0, %c0_i32, %c0_i32_0 : i32, i32, i32
  }
  func.func @transform_1(%arg0: i32) -> (i32, i32, i32) {
    %c0_i32 = arith.constant 0 : i32
    %c0_i32_0 = arith.constant 0 : i32
    %c0_i32_1 = arith.constant 0 : i32
    return %arg0, %c0_i32, %c0_i32_0 : i32, i32, i32
  }
}

</mosaic_0001>

<bundles_post_ra>
// kernel: _postprocess_batched.1
= control target key start
LH: loop header
LB: loop body
LE: loop exit
PB: predicated region body
PF: predicated region fallthrough
CT: control target
= control target key end

     0   :  { %vm10_vm0 = vcmask 89088   ;;  %v249_v4 = vmov 11   ;;  %v52_v16 = vlaneseq  ;;  %vm35_vm2 = vcmask 97280   ;;  %s251_s10 = smov 100   ;;  %s252_s11 = smov 96   ;;  %s323_s0 = inlined_call_operand.vmem [shape: f32[2,8,40], index: 0, kind: input, shape index: {}]   ;;  %s324_s1 = inlined_call_operand.vmem [shape: f32[2,8,128], index: 1, kind: output, shape index: {}]  }
   0x1   :  { %v272_v0 = vld [vmem:[%s323_s0] sm:$0xff]  ;;  %v277_v1 = vld [vmem:[%s323_s0 + $0x8] sm:$0xff]  ;;  %227 = vset.pattern.permute.xlu1 %v249_v4  ;;  %228 = vset.pattern.permute.xlu0 %v249_v4  ;;  %s250_s0 = smov 126   ;;  %s253_s12 = smov 98   ;;  %vm142_vm6 = vcmask 15360   ;;  %vm197_vm7 = vcmask 7168  }
   0x2   :  { %v11_v2 = vsel %vm10_vm0, %v272_v0, -inf  ;;  %v14_v3 = vsel %vm10_vm0, %v277_v1, -inf  ;;  %v53_v17 = vand.u32 127, %v52_v16  ;;  %v112_v26 = vmul.f32 0.5, %v272_v0  ;;  %s254_s13 = smov 102   ;;  %s255_s14 = smov 92  }
   0x3   :  { %12 = vmax.xlane.f32.xlu0 %v11_v2  ;;  %v113_v27 = vmul.f32 0.5, %v277_v1  ;;  %v216_v60 = vmul.f32 -1.442695, %v277_v1  ;;  %s256_s15 = smov 1   ;;  %s257_s16 = smov 5   ;;  %vm200_vm8 = vcmask 39936  }
   0x4   :  { %s258_s17 = smov 125   ;;  %vm203_vm9 = vcmask 72704   ;;  %vm206_vm10 = vcmask 203776  }
   0x7   :  { %15 = vmax.xlane.f32.xlu0 %v14_v3 }
  0x90   :  { %v13_v5 = vpop.xlane.xlu0 %12 }
  0x91   :  { %v17_v6 = vmax.f32 %v13_v5, %v272_v0  ;;  %vm54_vm3 = vcmp.eq.f32.partialorder %v272_v0, %v13_v5 }
  0x92   :  { %v56_v28 = vsel %vm54_vm3, %v53_v17, 12 }
  0x93   :  { %21 = vperm.xlu1 %227, %v17_v6   ;;  %v42_v7 = vsub.f32 %v13_v5, %v17_v6  ;;  %v58_v29 = vsel %vm10_vm0, %v56_v28, 2147483647 }
  0x94   :  { %v16_v8 = vpop.xlane.xlu0 %15  ;;  %v60_v30 = vshra.s32 %v58_v29, 16  ;;  %v59_v54 = vand.u32 65535, %v58_v29 }
  0x95   :  { %v18_v9 = vmax.f32 %v16_v8, %v277_v1  ;;  %vm55_vm1 = vcmp.eq.f32.partialorder %v277_v1, %v16_v8  ;;  %v44_v39 = vmul.f32 1.442695, %v42_v7 }
  0x96   :  { %v57_v18 = vsel %vm55_vm1, %v53_v17, 12  ;;  %v62_v31 = vcvt.s32.f32 %v60_v30  ;;  %v61_v55 = vcvt.s32.f32 %v59_v54 }
  0x97   :  { %26 = vperm.xlu1 %227, %v18_v9   ;;  %v73_v21 = vsel %vm10_vm0, %v57_v18, 2147483647  ;;  %v43_v40 = vsub.f32 %v16_v8, %v18_v9 }
  0x98   :  { %v75_v23 = vshra.s32 %v73_v21, 16  ;;  %v74_v50 = vand.u32 65535, %v73_v21 }
  0x99   :  { %v46_v42 = vmul.f32 1.442695, %v43_v40 }
  0x9a   :  { %v77_v25 = vcvt.s32.f32 %v75_v23  ;;  %v76_v51 = vcvt.s32.f32 %v74_v50 }
 0x112   :  { %v22_v10 = vpop.permute.xlu1 %21 }
 0x113   :  { %v29_v11 = vsub.f32 %v272_v0, %v22_v10 }
 0x115   :  { %v31_v12 = vmul.f32 1.442695, %v29_v11 }
 0x116   :  { %v27_v13 = vpop.permute.xlu1 %26 }
 0x117   :  { %229 = vpow2.f32 %v31_v12  ;;  %v30_v14 = vsub.f32 %v277_v1, %v27_v13 }
 0x119   :  { %v33_v15 = vmul.f32 1.442695, %v30_v14 }
 0x11b   :  { %231 = vpow2.f32 %v33_v15 }
 0x121   :  { %v230_v19 = vpop.eup %229 }
 0x122   :  { %v36_v20 = vsel %vm35_vm2, %v230_v19, 0.0 }
 0x123   :  { %37 = vadd.xlane.f32.xlu0 %v36_v20 }
 0x125   :  { %v232_v22 = vpop.eup %231 }
 0x126   :  { %v39_v24 = vsel %vm35_vm2, %v232_v22, 0.0 }
 0x127   :  { %40 = vadd.xlane.f32.xlu1 %v39_v24 }
 0x12b   :  { %78 = vmin.xlane.f32.xlu1 %v77_v25 }
 0x139   :  { %116 = vrot.lane.b32.xlu0 %v112_v26, %s250_s0 }
 0x13d   :  { %118 = vrot.lane.b32.xlu0 %v113_v27, %s250_s0 }
 0x15c   :  { %63 = vmin.xlane.f32.xlu0 %v62_v31 }
 0x1b0   :  { %v38_v32 = vpop.xlane.xlu0 %37 }
 0x1b1   :  { %233 = vrcp.f32 %v38_v32 }
 0x1b2   :  { %235 = vpow2.f32 %v44_v39 }
 0x1b4   :  { %v117_v33 = vpop.permute.xlu0 %116  ;;  %v41_v41 = vpop.xlane.xlu1 %40 }
 0x1b5   :  { %v122_v34 = vsub.f32 %v272_v0, %v117_v33  ;;  %v124_v37 = vadd.f32 %v117_v33, %v272_v0  ;;  %237 = vrcp.f32 %v41_v41 }
 0x1b6   :  { %239 = vpow2.f32 %v46_v42 }
 0x1b7   :  { %128 = vrot.lane.b32.xlu0 %v122_v34, %s251_s10  ;;  %241 = vpow2.f32 %v216_v60 }
 0x1b8   :  { %v119_v35 = vpop.permute.xlu0 %118  ;;  %v79_v49 = vpop.xlane.xlu1 %78 }
 0x1b9   :  { %v123_v36 = vsub.f32 %v277_v1, %v119_v35  ;;  %v125_v38 = vadd.f32 %v119_v35, %v277_v1  ;;  %vm80_vm4 = vcmp.eq.f32.partialorder %v77_v25, %v79_v49  ;;  %v85_v24 = vcvt.f32.s32 %v79_v49 }
 0x1ba   :  { %v81_v52 = vsel %vm80_vm4, %v76_v51, inf }
 0x1bb   :  { %157 = vrot.lane.b32.xlu0 %v123_v36, %s252_s11  ;;  %130 = vrot.lane.b32.xlu1 %v123_v36, %s251_s10  ;;  %v234_v43 = vpop.eup %233  ;;  %v86_v26 = vshll.u32 %v85_v24, 16 }
 0x1bc   :  { %v236_v44 = vpop.eup %235 }
 0x1bd   :  { %v49_v45 = vmul.f32 %v236_v44, %v234_v43 }
 0x1bf   :  { %163 = vrot.lane.b32.xlu0 %v125_v38, %s253_s12  ;;  %136 = vrot.lane.b32.xlu1 %v124_v37, %s254_s13  ;;  %v238_v46 = vpop.eup %237 }
 0x1c0   :  { %v240_v47 = vpop.eup %239 }
 0x1c1   :  { %v51_v48 = vmul.f32 %v240_v47, %v238_v46  ;;  %v242_v10 = vpop.eup %241 }
 0x1c2   :  { %v95_v11 = vadd.f32 1.0, %v242_v10 }
 0x1c3   :  { %138 = vrot.lane.b32.xlu1 %v125_v38, %s254_s13 }
 0x1c7   :  { %147 = vrot.lane.b32.xlu1 %v272_v0, %s255_s14 }
 0x1cb   :  { %149 = vrot.lane.b32.xlu1 %v277_v1, %s255_s14  ;;  %v215_v1 = vmul.f32 -1.442695, %v272_v0 }
 0x1cd   :  { %243 = vpow2.f32 %v215_v1 }
 0x1ce   :  { %245 = vrcp.f32 %v95_v11 }
 0x1cf   :  { %102 = vperm.xlu1 %227, %v49_v45  }
 0x1d3   :  { %107 = vperm.xlu1 %227, %v51_v48  }
 0x1d7   :  { %155 = vrot.lane.b32.xlu1 %v122_v34, %s252_s11  ;;  %v244_v12 = vpop.eup %243 }
 0x1d8   :  { %v94_v14 = vadd.f32 1.0, %v244_v12  ;;  %v246_v15 = vpop.eup %245 }
 0x1da   :  { %247 = vrcp.f32 %v94_v14 }
 0x1db   :  { %161 = vrot.lane.b32.xlu1 %v124_v37, %s253_s12 }
 0x1de   :  { %82 = vmin.xlane.f32.xlu0 %v81_v52 }
 0x1e4   :  { %v248_v21 = vpop.eup %247 }
 0x1e9   :  { %v299_v53 = vpop.xlane.xlu0 %63 }
 0x1ea   :  { %vm65_vm5 = vcmp.eq.f32.partialorder %v62_v31, %v299_v53  ;;  %v70_v34 = vcvt.f32.s32 %v299_v53 }
 0x1eb   :  { %v66_v56 = vsel %vm65_vm5, %v61_v55, inf }
 0x1ec   :  { %v71_v40 = vshll.u32 %v70_v34, 16 }
 0x1ff   :  { %67 = vmin.xlane.f32.xlu1 %v66_v56 }
 0x229   :  { %v129_v58 = vpop.permute.xlu0 %128 }
 0x22d   :  { %v131_v57 = vpop.permute.xlu1 %130  ;;  %v158_v61 = vpop.permute.xlu0 %157 }
 0x231   :  { %v137_v59 = vpop.permute.xlu1 %136  ;;  %v164_v3 = vpop.permute.xlu0 %163 }
 0x232   :  { %v143_v63 = vsel %vm142_vm6, %v129_v58, %v137_v59  ;;  %v168_v5 = vsel %vm142_vm6, %v158_v61, %v164_v3 }
 0x235   :  { %v139_v62 = vpop.permute.xlu1 %138 }
 0x236   :  { %v144_v6 = vsel %vm142_vm6, %v131_v57, %v139_v62 }
 0x239   :  { %v148_v2 = vpop.permute.xlu1 %147 }
 0x23a   :  { %v153_v4 = vmul.f32 %v148_v2, %v143_v63 }
 0x23c   :  { %175 = vrot.lane.b32.xlu0 %v153_v4, %s256_s15 }
 0x23d   :  { %v150_v7 = vpop.permute.xlu1 %149 }
 0x23e   :  { %v154_v8 = vmul.f32 %v150_v7, %v144_v6  ;;  %v170_v9 = vmul.f32 %v168_v5, %v150_v7 }
 0x240   :  { %177 = vrot.lane.b32.xlu1 %v154_v8, %s256_s15  ;;  %185 = vrot.lane.b32.xlu0 %v170_v9, %s257_s16 }
 0x24e   :  { %v103_v13 = vpop.permute.xlu1 %102 }
 0x24f   :  { %v110_v22 = vmul.f32 %v248_v21, %v103_v13 }
 0x252   :  { %v108_v16 = vpop.permute.xlu1 %107 }
 0x253   :  { %v111_v17 = vmul.f32 %v246_v15, %v108_v16 }
 0x255   :  { %193 = vrot.lane.b32.xlu0 %v111_v17, %s258_s17 }
 0x256   :  { %v156_v18 = vpop.permute.xlu1 %155 }
 0x25a   :  { %v162_v19 = vpop.permute.xlu1 %161 }
 0x25b   :  { %v167_v0 = vsel %vm142_vm6, %v156_v18, %v162_v19 }
 0x25c   :  { %v169_v20 = vmul.f32 %v167_v0, %v148_v2 }
 0x25e   :  { %183 = vrot.lane.b32.xlu1 %v169_v20, %s257_s16 }
 0x262   :  { %191 = vrot.lane.b32.xlu1 %v110_v22, %s258_s17 }
 0x26b   :  { %v83_v23 = vpop.xlane.xlu0 %82 }
 0x26c   :  { %v84_v25 = vcvt.f32.s32 %v83_v23 }
 0x26e   :  { %v87_v29 = vadd.s32 %v86_v26, %v84_v25 }
 0x270   :  { %v172_v31 = vcvt.s32.f32 %v87_v29 }
 0x28c   :  { %v68_v27 = vpop.xlane.xlu1 %67 }
 0x28d   :  { %v69_v38 = vcvt.f32.s32 %v68_v27 }
 0x28f   :  { %v72_v41 = vadd.s32 %v71_v40, %v69_v38 }
 0x291   :  { %v171_v43 = vcvt.s32.f32 %v72_v41 }
 0x2ae   :  { %v176_v28 = vpop.permute.xlu0 %175 }
 0x2af   :  { %v198_v44 = vsel %vm197_vm7, %v171_v43, %v176_v28 }
 0x2b2   :  { %v178_v30 = vpop.permute.xlu1 %177  ;;  %v186_v32 = vpop.permute.xlu0 %185 }
 0x2b3   :  { %v199_v33 = vsel %vm197_vm7, %v172_v31, %v178_v30 }
 0x2b4   :  { %v202_v35 = vsel %vm200_vm8, %v199_v33, %v186_v32 }
 0x2c7   :  { %v194_v36 = vpop.permute.xlu0 %193 }
 0x2c8   :  { %v205_v37 = vsel %vm203_vm9, %v202_v35, %v194_v36 }
 0x2c9   :  { %v208_v39 = vsel %vm206_vm10, %v205_v37, 0.0 }
 0x2ca   :  { %210 = vst [vmem:[%s324_s1 + $0x8] sm:$0xff] %v208_v39 }
 0x2d0   :  { %v184_v42 = vpop.permute.xlu1 %183 }
 0x2d1   :  { %v201_v45 = vsel %vm200_vm8, %v198_v44, %v184_v42 }
 0x2d4   :  { %v192_v46 = vpop.permute.xlu1 %191 }
 0x2d5   :  { %v204_v47 = vsel %vm203_vm9, %v201_v45, %v192_v46 }
 0x2d6   :  { %v207_v48 = vsel %vm206_vm10, %v204_v47, 0.0 }
 0x2d7   :  { %209 = vst [vmem:[%s324_s1] sm:$0xff] %v207_v48 }

</bundles_post_ra>
